<compile_context>
chip_gen: v5e
topology: v5e:2x2
jax: 0.10.0
libtpu: 0.0.40
codegen_flags: <defaults>
</compile_context>

<pallas_src>
import jax
import jax.numpy as jnp
from jax.experimental import pallas as pl
from jax.experimental.pallas import tpu as pltpu


def _round_up(x, m):
    return ((x + m - 1) // m) * m


def _pick_tile(dim, candidates):
    """Largest candidate that divides `dim`; else the full dim (always legal)."""
    for c in candidates:
        if c <= dim and dim % c == 0:
            return c
    return dim


def _vmem_bytes(R, tt, tn, E):
    # Double-buffered block footprint: X (f32) + W_x (bf16) + ctx (f32) + out (f32).
    return (2 * (R * tt * E * 4)
            + 2 * (E * tn * 2)
            + 2 * (R * tn * 4)
            + 2 * (R * tt * tn * 4))


# ----------------------------------------------------------------------------
# Pallas kernel: one (vocab-tile, batch-group, token-tile) block of
#   out = X @ W_x + broadcast(state @ W_h + b)
# ----------------------------------------------------------------------------
def _decoder_proj_kernel(x_ref, ctx_ref, wx_ref, o_ref):
    # x_ref  : [R, tt, E]  f32   (R batch rows x tt decoder-step embeddings)
    # ctx_ref: [R, 1,  tn] f32   (precomputed state @ W_h + b, one row per batch)
    # wx_ref : [E, tn]     bf16  (vocab slab of the embedding->vocab weight)
    # o_ref  : [R, tt, tn] f32
    R, tt, E = x_ref.shape
    # Collapse batch-group x tokens so the MXU sees a full-height [R*tt, E] tile;
    # cast to bf16 on the VPU in-kernel (no wrapper-side extra HBM pass).
    x2 = x_ref[...].reshape(R * tt, E).astype(jnp.bfloat16)
    acc = jnp.dot(x2, wx_ref[...], preferred_element_type=jnp.float32)   # [R*tt, tn]
    o_ref[...] = (acc.reshape(R, tt, acc.shape[-1]) + ctx_ref[...]).astype(o_ref.dtype)


def decoder_projection(x, ctxb, w_x_bf16):
    """Fused decoder output projection.

    x        : [B, T, E]  f32 decoder-step embeddings
    ctxb     : [B, V]     f32 precomputed state @ W_h + b (per-batch vocab bias)
    w_x_bf16 : [E, V]     bf16 embedding->vocab weight
    returns float32 logits [B, T, V] == concat(x, bcast(state)) @ [W_x; W_h] + b
    """
    B, T, E = x.shape
    V = w_x_bf16.shape[-1]

    # Lane-dense vocab axis: pad to a multiple of 128 (unmasked full-width stores).
    V_pad = max(_round_up(V, 128), 128)
    if V_pad != V:
        w_x_bf16 = jnp.pad(w_x_bf16, ((0, 0), (0, V_pad - V)))
        ctxb = jnp.pad(ctxb, ((0, 0), (0, V_pad - V)))

    # Row grouping: for small T keep the whole sequence per tile and pack R
    # batch rows so the MXU M-dimension is R*T (up to 256); for long T tile T.
    if T >= 256:
        R = 1
        tt = _pick_tile(T, (256, 128, 64, 32, 16, 8))
    else:
        tt = T
        R = 1
        for r in range(B, 0, -1):
            if B % r == 0 and r * T <= 256:
                R = r
                break

    # Vocab tile: biggest lane-dense tile that keeps double-buffered blocks
    # under ~40 MiB (leaves headroom on v7x's 64 MiB VMEM; plenty on v5e/v6e).
    tn = 128
    for c in (2048, 1024, 512, 256, 128):
        if c <= V_pad and V_pad % c == 0 and _vmem_bytes(R, tt, c, E) <= (40 << 20):
            tn = c
            break

    ctx3 = ctxb.astype(jnp.float32).reshape(B, 1, V_pad)

    # Vocab axis OUTERMOST: W_x block index depends only on it, so each weight
    # slab is fetched once per vocab tile and stays VMEM-resident across the
    # (batch-group, token-tile) inner axes.
    grid = (V_pad // tn, B // R, T // tt)

    vmem_need = _vmem_bytes(R, tt, tn, E)
    vmem_limit = min(max(vmem_need + (8 << 20), 32 << 20), 56 << 20)

    out = pl.pallas_call(
        _decoder_proj_kernel,
        out_shape=jax.ShapeDtypeStruct((B, T, V_pad), jnp.float32),
        grid_spec=pltpu.PrefetchScalarGridSpec(
            num_scalar_prefetch=0,
            grid=grid,
            in_specs=[
                # X: changes with (batch-group, token-tile); full E per tile.
                pl.BlockSpec((R, tt, E), lambda vi, bi, ti: (bi, ti, 0)),
                # Precomputed per-batch context bias: one vocab slab per batch group.
                pl.BlockSpec((R, 1, tn), lambda vi, bi, ti: (bi, 0, vi)),
                # Weight: depends only on the OUTERMOST vocab axis -> resident.
                pl.BlockSpec((E, tn), lambda vi, bi, ti: (0, vi)),
            ],
            out_specs=pl.BlockSpec((R, tt, tn), lambda vi, bi, ti: (bi, ti, vi)),
        ),
        compiler_params=pltpu.CompilerParams(
            # No reduction axis is tiled: all three grid axes are independent.
            dimension_semantics=("parallel", "parallel", "parallel"),
            vmem_limit_bytes=vmem_limit,
        ),
        cost_estimate=pl.CostEstimate(
            flops=2 * B * T * E * V_pad,
            transcendentals=0,
            bytes_accessed=(4 * B * T * E          # X f32
                            + 2 * E * V_pad        # W_x bf16
                            + 4 * B * V_pad        # ctx bias f32
                            + 4 * B * T * V_pad),  # logits f32
        ),
    )(x.astype(jnp.float32), ctx3, w_x_bf16)

    if V_pad != V:
        out = out[:, :, :V]
    return out


# ----------------------------------------------------------------------------
# Concrete decoder wrapper (mirrors the Decoder interface)
# ----------------------------------------------------------------------------
class PallasDecoder:
    def __init__(self, embed_dim, hidden_dim, vocab_size, key):
        self.embed_dim = embed_dim
        self.hidden_dim = hidden_dim
        self.vocab_size = vocab_size
        k_w, k_b = jax.random.split(key)
        # One logical weight [E+H, V]; stored split.  W_x is pre-cast to bf16
        # once (MXU operand); W_h stays f32 for the tiny hoisted XLA matmul.
        W = jax.random.normal(
            k_w, (embed_dim + hidden_dim, vocab_size), dtype=jnp.float32) * 0.02
        self.W_x = W[:embed_dim].astype(jnp.bfloat16)      # [E, V]
        self.W_h = W[embed_dim:]                           # [H, V] f32
        self.b = jax.random.normal(k_b, (vocab_size,), dtype=jnp.float32) * 0.02

    def init_state(self, enc_outputs, *args):
        # enc_outputs: [B, S, H] -> use final encoder step as context [B, H]
        return enc_outputs[:, -1, :]

    def forward(self, X, state):
        # Hoisted context projection: tiny [B,H]x[H,V] f32 matmul in plain XLA,
        # fused bias add; the Pallas kernel only adds the resulting [B, V] row.
        ctxb = state.astype(jnp.float32) @ self.W_h + self.b       # [B, V]
        out = decoder_projection(X, ctxb, self.W_x)                # [B, T, V]
        return out, state


# ----------------------------------------------------------------------------
if __name__ == "__main__":
    key = jax.random.PRNGKey(0)
    k_enc, k_x, k_params = jax.random.split(key, 3)

    B, T, S = 2, 8, 8       # batch, decoder steps, encoder steps
    E, H, V = 32, 32, 128   # embed dim, hidden dim, vocab size

    dec = PallasDecoder(embed_dim=E, hidden_dim=H, vocab_size=V, key=k_params)

    enc_outputs = jax.random.normal(k_enc, (B, S, H), dtype=jnp.float32)
    X = jax.random.normal(k_x, (B, T, E), dtype=jnp.float32)

    state = dec.init_state(enc_outputs)
    out, new_state = dec.forward(X, state)
    jax.block_until_ready(out)

    # Plain-JAX reference: bf16 X/W_x with f32 accumulation + exact f32 context.
    ref = (
        jnp.einsum("bte,ev->btv", X.astype(jnp.bfloat16), dec.W_x,
                   preferred_element_type=jnp.float32)
        + (state @ dec.W_h + dec.b)[:, None, :]
    )

    assert out.shape == (B, T, V)
    assert out.dtype == jnp.float32
    assert jnp.allclose(out, ref, atol=2e-3, rtol=2e-3), \
        float(jnp.max(jnp.abs(out - ref)))

    print("KERNEL_OK")
</pallas_src>

<mosaic_0001>
module attributes {stable_mosaic.version = 11 : i64} {
  func.func @_decoder_proj_kernel(%arg0: i32, %arg1: i32, %arg2: i32, %arg3: memref<2x8x32xf32, #tpu.memory_space<vmem>>, %arg4: memref<2x1x128xf32, #tpu.memory_space<vmem>>, %arg5: memref<32x128xbf16, #tpu.memory_space<vmem>>, %arg6: memref<2x8x128xf32, #tpu.memory_space<vmem>>) attributes {dimension_semantics = [#tpu.dimension_semantics<parallel>, #tpu.dimension_semantics<parallel>, #tpu.dimension_semantics<parallel>], iteration_bounds = array<i64: 1, 1, 1>, scalar_prefetch = 0 : i64, scratch_operands = 0 : i64, tpu.core_type = #tpu.core_type<tc>, window_params = [{transform_indices = @transform_0, window_bounds = array<i64: 2, 8, 32>}, {transform_indices = @transform_1, window_bounds = array<i64: 2, 1, 128>}, {transform_indices = @transform_2, window_bounds = array<i64: 32, 128>}, {transform_indices = @transform_3, window_bounds = array<i64: 2, 8, 128>}]} {
    %c0 = arith.constant 0 : index
    %c0_0 = arith.constant 0 : index
    %c0_1 = arith.constant 0 : index
    %0 = vector.load %arg3[%c0, %c0_0, %c0_1] : memref<2x8x32xf32, #tpu.memory_space<vmem>>, vector<2x8x32xf32>
    %1 = vector.shape_cast %0 : vector<2x8x32xf32> to vector<16x32xf32>
    %2 = arith.truncf %1 : vector<16x32xf32> to vector<16x32xbf16>
    %c0_2 = arith.constant 0 : index
    %c0_3 = arith.constant 0 : index
    %3 = vector.load %arg5[%c0_2, %c0_3] : memref<32x128xbf16, #tpu.memory_space<vmem>>, vector<32x128xbf16>
    %cst = arith.constant dense<0.000000e+00> : vector<16x128xf32>
    %4 = tpu.matmul %2, %3, %cst {dimension_numbers = #tpu.dot_dimension_numbers<[1], [0], [0], [1], [0, 0, 1, 1], [], []>} : vector<16x32xbf16>, vector<32x128xbf16>, vector<16x128xf32> -> vector<16x128xf32>
    %5 = vector.shape_cast %4 : vector<16x128xf32> to vector<2x8x128xf32>
    %c0_4 = arith.constant 0 : index
    %c0_5 = arith.constant 0 : index
    %c0_6 = arith.constant 0 : index
    %6 = vector.load %arg4[%c0_4, %c0_5, %c0_6] : memref<2x1x128xf32, #tpu.memory_space<vmem>>, vector<2x1x128xf32>
    %7 = vector.broadcast %6 : vector<2x1x128xf32> to vector<2x8x128xf32>
    %8 = arith.addf %5, %7 : vector<2x8x128xf32>
    %c0_7 = arith.constant 0 : index
    %c0_8 = arith.constant 0 : index
    %c0_9 = arith.constant 0 : index
    %9 = vector.load %arg6[%c0_7, %c0_8, %c0_9] : memref<2x8x128xf32, #tpu.memory_space<vmem>>, vector<2x8x128xf32>
    tpu.vector_store %arg6[%c0_7, %c0_8, %c0_9], %8 {strides = array<i32>} : memref<2x8x128xf32, #tpu.memory_space<vmem>>, vector<2x8x128xf32>,
    return
  }
  func.func @transform_0(%arg0: i32, %arg1: i32, %arg2: i32) -> (i32, i32, i32) {
    %c0_i32 = arith.constant 0 : i32
    %c0_i32_0 = arith.constant 0 : i32
    return %arg1, %arg2, %c0_i32 : i32, i32, i32
  }
  func.func @transform_1(%arg0: i32, %arg1: i32, %arg2: i32) -> (i32, i32, i32) {
    %c0_i32 = arith.constant 0 : i32
    %c0_i32_0 = arith.constant 0 : i32
    return %arg1, %c0_i32, %arg0 : i32, i32, i32
  }
  func.func @transform_2(%arg0: i32, %arg1: i32, %arg2: i32) -> (i32, i32) {
    %c0_i32 = arith.constant 0 : i32
    %c0_i32_0 = arith.constant 0 : i32
    return %c0_i32, %arg0 : i32, i32
  }
  func.func @transform_3(%arg0: i32, %arg1: i32, %arg2: i32) -> (i32, i32, i32) {
    %c0_i32 = arith.constant 0 : i32
    return %arg1, %arg2, %arg0 : i32, i32, i32
  }
}

</mosaic_0001>

<bundles_post_ra>
// kernel: tpu_custom_call.1
= control target key start
LH: loop header
LB: loop body
LE: loop exit
PB: predicated region body
PF: predicated region fallthrough
CT: control target
= control target key end

     0   :  { %8 = vsyncpa [#allocation3], 0  ;;  %s305_s0 = inlined_call_operand.hbm [shape: f32[2,8,32], index: 0, kind: input, shape index: {}]   ;;  %s306_s1 = inlined_call_operand.hbm [shape: f32[2,1,128], index: 1, kind: input, shape index: {}]   ;;  %s307_s2 = inlined_call_operand.hbm [shape: bf16[32,128], index: 2, kind: input, shape index: {}]   ;;  %s308_s3 = inlined_call_operand.hbm [shape: f32[2,8,128], index: 3, kind: output, shape index: {}]  }
   0x1   :  { %9 = vsyncpa [#allocation6], 0  ;;  %s28_s14 = sshll.u32 %s306_s1, 4  ;;  %s29_s14 = int_to_ptr.hbm [resolvable:$true] %s28_s14 }
   0x2   :  { %10 = vsyncpa [#allocation4], 0  ;;  %s257_s15 = smov [#allocation5]   ;;  %s15_s19 = sshll.u32 %s305_s0, 4  ;;  %s16_s19 = int_to_ptr.hbm [resolvable:$true] %s15_s19 }
   0x3   :  { %s30_s16 = sshll.u32 %s257_s15, 4  ;;  %s258_s20 = smov 16   ;;  %s31_s16 = int_to_ptr.vmem [resolvable:$true] %s30_s16 }
   0x4   :  { %s259_s21 = smov 1   ;;  %s260_s22 = smov [#allocation2]  }
   0x5   :  { %36 = dma.hbm_to_vmem [thread:$0]  %s29_s14, 32, %s31_s16, [#allocation6], %s258_s20, %s258_s20, %s259_s21  }
   0x6   :  { %s17_s23 = sshll.u32 %s260_s22, 4  ;;  %s261_s24 = smov 128   ;;  %s18_s23 = int_to_ptr.vmem [resolvable:$true] %s17_s23 }
   0x7   :  { %s262_s25 = smov 8   ;;  %s41_s27 = sshll.u32 %s307_s2, 4  ;;  %s42_s27 = int_to_ptr.hbm [resolvable:$true] %s41_s27 }
   0x8   :  { %23 = dma.hbm_to_vmem [thread:$0]  %s16_s19, 256, %s18_s23, [#allocation3], %s261_s24, %s261_s24, %s262_s25  }
   0x9   :  { %s263_s28 = smov [#allocation7]   ;;  %s264_s29 = smov 64  }
   0xa   :  { %s43_s0 = sshll.u32 %s263_s28, 4  ;;  %s265_s30 = smov 4   ;;  %s44_s0 = int_to_ptr.vmem [resolvable:$true] %s43_s0 }
   0xb   :  { %49 = dma.hbm_to_vmem [thread:$0]  %s42_s27, 256, %s44_s0, [#allocation6], %s264_s29, %s264_s29, %s265_s30  }
   0xc   :  { %251 = dma.done.wait [#allocation3], 256  }
   0xd   :  { %252 = vsyncadd [#allocation3], 4294967040 }
   0xe   :  { %253 = dma.done.wait [#allocation6], 288  }
   0xf   :  { %254 = vsyncadd [#allocation6], 4294967008  ;;  %v142_v0 = vld [vmem:[#allocation7 + $0x8] sm:$0xff]  ;;  %v141_v1 = vld [vmem:[#allocation7] sm:$0xff]  ;;  %vm82_vm0 = vcmask 261120   ;;  %s266_s2 = smov [#allocation8]  }
  0x10   :  { %92 = vmatpush.bf16.msra.mxu0 %v142_v0  ;;  %v63_v2 = vld [vmem:[#allocation2] sm:$0xff]  ;;  %v64_v3 = vld [vmem:[#allocation2 + $0x8] sm:$0xff]  ;;  %v153_v5 = vld [vmem:[#allocation5] ss:$0 sm:$0xff]  ;;  %s116_s4 = sshll.u32 %s266_s2, 4  ;;  %s118_s7 = sshll.u32 %s308_s3, 4  ;;  %s117_s4 = int_to_ptr.vmem [resolvable:$true] %s116_s4  ;;  %s119_s7 = int_to_ptr.hbm [resolvable:$true] %s118_s7 }
  0x11   :  { %v65_v4 = vpack.c.bf16 %v64_v3, %v63_v2  ;;  %v154_v8 = vld [vmem:[#allocation5 + $0x1] ss:$0 sm:$0xff] }
  0x14   :  { %93 = vmatpush.bf16.msra.mxu0 %v141_v1 }
  0x17   :  { %140 = vmatmul.msk.bf16.vlgmr.msra.gmra.mxu0 %vm82_vm0, %v65_v4 }
  0x94   :  { %v95_v6 = vpop.f32.mrf.mxu0 }
  0x95   :  { %v108_v7 = vadd.f32 %v153_v5, %v95_v6 }
  0x97   :  { %110 = vst [vmem:[#allocation8] sm:$0xff] %v108_v7 }
  0x9c   :  { %v97_v9 = vpop.f32.mrf.mxu0 }
  0x9d   :  { %v109_v10 = vadd.f32 %v154_v8, %v97_v9 }
  0x9f   :  { %111 = vst [vmem:[#allocation8 + $0x8] sm:$0xff] %v109_v10 }
  0xa0   :  { %124 = dma.vmem_to_hbm [thread:$0]  %s117_s4, 256, %s119_s7, [#allocation4], %s261_s24, %s261_s24, %s262_s25  }
  0xa1   :  { %255 = dma.done.wait [#allocation4], 256  }
  0xa2   :  { %256 = vsyncadd [#allocation4], 4294967040 }
  0xa3   :  { %129 = vsyncpa [#allocation3], 1 }
  0xa4   :  { %130 = vsyncpa [#allocation6], 1 }
  0xa5   :  { %131 = vsyncpa [#allocation4], 1 }

</bundles_post_ra>
